<compile_context>
chip_gen: v7x
topology: tpu7x:2x2x1
jax: 0.10.0
libtpu: 0.0.40
codegen_flags: <defaults>
</compile_context>

<pallas_src>
import functools

import jax
import jax.numpy as jnp
from jax.experimental import pallas as pl
from jax.experimental.pallas import tpu as pltpu

LANE = 128
_SINGLE_TILE_MAX = 1024   # batches up to this run as one tile (TB == B, no padding at all)
_TARGET_TILE = 1024       # large-batch tile target (v6e sweep: 1024 ~ 86% of HBM roofline)


def _round_up(n, m):
    return -(-n // m) * m


def _dueling_kernel(x_ref, w_ref, b_ref, out_ref):
    """Fused 3-layer packed MLP.  The dueling combine is pre-folded into layer 3, so the
    body is pure matmul + bias (+ ReLU) x3 and a narrow (action_size-wide) store."""
    S = x_ref.shape[-1]        # true (un-padded) state size
    A = out_ref.shape[-1]      # action size (narrow output slab)

    x = x_ref[...].astype(jnp.bfloat16)                                   # (TB, S)

    # layer 1: contract only the S live rows of the packed 128x128 weight tile (K = S).
    h = jnp.dot(x, w_ref[0, :S, :], preferred_element_type=jnp.float32) + b_ref[0]
    h = jnp.maximum(h, 0.0)
    # layer 2: block-diagonal [adv | val] hidden.
    h = jnp.dot(h.astype(jnp.bfloat16), w_ref[1],
                preferred_element_type=jnp.float32) + b_ref[1]
    h = jnp.maximum(h, 0.0)
    # layer 3: dueling combine already folded into the packed weights/bias.
    q = jnp.dot(h.astype(jnp.bfloat16), w_ref[2],
                preferred_element_type=jnp.float32) + b_ref[2]            # (TB, 128)

    # cols [0, A) of q ARE the Q-values; cols >= A are exact zeros (zero-padded weights).
    out_ref[...] = q[:, :A]


def _tiling(batch):
    """Pick (tile_rows, padded_batch)."""
    if batch <= _SINGLE_TILE_MAX:
        return batch, batch                      # one tile, block dims == array dims
    n_tiles = -(-batch // _TARGET_TILE)
    if n_tiles % 2:
        n_tiles += 1                             # even step count -> v7x 2-TC sharding
    tb = _round_up(-(-batch // n_tiles), 16)     # 16-row multiple (bf16 sublane packing)
    return tb, tb * n_tiles


@functools.partial(jax.jit, static_argnames=("action_size",))
def _forward(state, W, b, *, action_size):
    B, S = state.shape
    D = W.shape[-1]
    TB, B_pad = _tiling(B)

    x = state
    if B_pad != B:
        x = jnp.zeros((B_pad, S), state.dtype).at[:B].set(state)

    out = pl.pallas_call(
        _dueling_kernel,
        out_shape=jax.ShapeDtypeStruct((B_pad, action_size), jnp.float32),
        grid=(B_pad // TB,),
        in_specs=[
            pl.BlockSpec((TB, S), lambda i: (i, 0)),         # un-padded state tile
            pl.BlockSpec((3, D, D), lambda i: (0, 0, 0)),    # weights: VMEM-resident
            pl.BlockSpec((3, 1, D), lambda i: (0, 0, 0)),    # biases:  VMEM-resident
        ],
        out_specs=pl.BlockSpec((TB, action_size), lambda i: (i, 0)),
        compiler_params=pltpu.CompilerParams(
            dimension_semantics=("parallel",)),
    )(x, W, b)

    return out[:B] if B_pad != B else out


def dueling_q_forward(state, packed):
    """state: (B, state_size) float32; packed: output of pack_params()."""
    return _forward(state.astype(jnp.float32), packed["W"], packed["b"],
                    action_size=packed["action_size"])


def init_params(key, state_size, action_size, fc1_units=64, fc2_units=64):
    """Deterministic synthetic init (PyTorch-Linear-like uniform fan-in scaling)."""
    def linear(k, fan_in, fan_out):
        k_w, k_b = jax.random.split(k)
        bound = 1.0 / jnp.sqrt(fan_in)
        w = jax.random.uniform(k_w, (fan_in, fan_out), jnp.float32, -bound, bound)
        bb = jax.random.uniform(k_b, (1, fan_out), jnp.float32, -bound, bound)
        return w, bb

    keys = jax.random.split(key, 6)
    wv1, bv1 = linear(keys[0], state_size, fc1_units)
    wv2, bv2 = linear(keys[1], fc1_units, fc2_units)
    wv3, bv3 = linear(keys[2], fc2_units, 1)
    wa1, ba1 = linear(keys[3], state_size, fc1_units)
    wa2, ba2 = linear(keys[4], fc1_units, fc2_units)
    wa3, ba3 = linear(keys[5], fc2_units, action_size)
    return dict(wv1=wv1, bv1=bv1, wv2=wv2, bv2=bv2, wv3=wv3, bv3=bv3,
                wa1=wa1, ba1=ba1, wa2=wa2, ba2=ba2, wa3=wa3, ba3=ba3)


def pack_params(p, state_size, action_size, fc1_units=64, fc2_units=64):
    """Pack both streams into one 3-layer block-diagonal MLP with the dueling combine
    folded into layer 3.

    Hidden layout: [adv units | val units | zero pad].  Layer-3 columns [0, A) produce
    the final Q-values directly:
        Q[:, j] = h_adv @ (wa3[:, j] - mean_k wa3[:, k]) + h_val @ wv3
                  + (ba3[j] - mean(ba3) + bv3)
    All padding is exact zeros, so the streams never mix and padded hidden units stay
    identically zero through ReLU.
    """
    D = max(_round_up(state_size, LANE), _round_up(2 * fc1_units, LANE),
            _round_up(2 * fc2_units, LANE), _round_up(action_size, LANE))

    W = jnp.zeros((3, D, D), jnp.float32)
    b = jnp.zeros((3, 1, D), jnp.float32)

    # layer 1: [adv | val] concatenated along the output dim
    W = W.at[0, :state_size, :fc1_units].set(p["wa1"])
    W = W.at[0, :state_size, fc1_units:2 * fc1_units].set(p["wv1"])
    b = b.at[0, :, :fc1_units].set(p["ba1"])
    b = b.at[0, :, fc1_units:2 * fc1_units].set(p["bv1"])

    # layer 2: block-diagonal
    W = W.at[1, :fc1_units, :fc2_units].set(p["wa2"])
    W = W.at[1, fc1_units:2 * fc1_units, fc2_units:2 * fc2_units].set(p["wv2"])
    b = b.at[1, :, :fc2_units].set(p["ba2"])
    b = b.at[1, :, fc2_units:2 * fc2_units].set(p["bv2"])

    # layer 3: dueling combine folded into the packed weights / bias
    wa3_centered = p["wa3"] - jnp.mean(p["wa3"], axis=1, keepdims=True)          # (fc2, A)
    W = W.at[2, :fc2_units, :action_size].set(wa3_centered)
    W = W.at[2, fc2_units:2 * fc2_units, :action_size].set(
        jnp.broadcast_to(p["wv3"], (fc2_units, action_size)))
    b3 = p["ba3"] - jnp.mean(p["ba3"]) + p["bv3"][0, 0]                          # (1, A)
    b = b.at[2, :, :action_size].set(b3)

    return dict(W=W.astype(jnp.bfloat16), b=b, action_size=action_size)


def _reference_forward(state, p):
    """Pure-JAX f32 reference matching the PyTorch module semantics."""
    def mlp(x, w1, b1, w2, b2, w3, b3):
        h1 = jnp.maximum(x @ w1 + b1, 0.0)
        h2 = jnp.maximum(h1 @ w2 + b2, 0.0)
        return h2 @ w3 + b3
    val = mlp(state, p["wv1"], p["bv1"], p["wv2"], p["bv2"], p["wv3"], p["bv3"])
    adv = mlp(state, p["wa1"], p["ba1"], p["wa2"], p["ba2"], p["wa3"], p["ba3"])
    return val + (adv - adv.mean(axis=1, keepdims=True))


if __name__ == "__main__":
    key = jax.random.PRNGKey(0)
    k_params, k_state = jax.random.split(key)

    batch = 8
    state_size = 16      # input_shape[0]
    action_size = 4      # output_shape[0]
    fc1_units = 64
    fc2_units = 64

    params = init_params(k_params, state_size, action_size, fc1_units, fc2_units)
    packed = pack_params(params, state_size, action_size, fc1_units, fc2_units)

    state = jax.random.normal(k_state, (batch, state_size), dtype=jnp.float32)
    q = jax.block_until_ready(dueling_q_forward(state, packed))
    q_ref = _reference_forward(state, params)
    assert q.shape == (batch, action_size)
    # bf16 matmul inputs (f32 accumulation) -> loosened tolerance vs f32 reference.
    assert jnp.allclose(q, q_ref, atol=3e-2, rtol=3e-2), "mismatch vs JAX reference (B=8)"

    # Also exercise a batch that is not a sublane multiple (single-tile path, TB == B).
    state_odd = jax.random.normal(jax.random.PRNGKey(1), (13, state_size), jnp.float32)
    q_odd = jax.block_until_ready(dueling_q_forward(state_odd, packed))
    q_odd_ref = _reference_forward(state_odd, params)
    assert q_odd.shape == (13, action_size)
    assert jnp.allclose(q_odd, q_odd_ref, atol=3e-2, rtol=3e-2), "mismatch vs reference (B=13)"

    print("KERNEL_OK")
</pallas_src>

<mosaic_0001>
module attributes {stable_mosaic.version = 11 : i64} {
  func.func @_dueling_kernel(%arg0: i32, %arg1: memref<8x16xf32, #tpu.memory_space<vmem>>, %arg2: memref<3x128x128xbf16, #tpu.memory_space<vmem>>, %arg3: memref<3x1x128xf32, #tpu.memory_space<vmem>>, %arg4: memref<8x4xf32, #tpu.memory_space<vmem>>) attributes {dimension_semantics = [#tpu.dimension_semantics<parallel>], iteration_bounds = array<i64: 1>, scalar_prefetch = 0 : i64, scratch_operands = 0 : i64, tpu.core_type = #tpu.core_type<tc>, window_params = [{transform_indices = @transform_0, window_bounds = array<i64: 8, 16>}, {pipeline_mode = #tpu.pipeline_mode<synchronous>, transform_indices = @transform_1, window_bounds = array<i64: 3, 128, 128>}, {pipeline_mode = #tpu.pipeline_mode<synchronous>, transform_indices = @transform_2, window_bounds = array<i64: 3, 1, 128>}, {transform_indices = @transform_3, window_bounds = array<i64: 8, 4>}]} {
    %c0 = arith.constant 0 : index
    %c0_0 = arith.constant 0 : index
    %0 = vector.load %arg1[%c0, %c0_0] : memref<8x16xf32, #tpu.memory_space<vmem>>, vector<8x16xf32>
    %1 = arith.truncf %0 : vector<8x16xf32> to vector<8x16xbf16>
    %c0_1 = arith.constant 0 : index
    %c0_2 = arith.constant 0 : index
    %c0_3 = arith.constant 0 : index
    %2 = vector.load %arg2[%c0_1, %c0_2, %c0_3] : memref<3x128x128xbf16, #tpu.memory_space<vmem>>, vector<1x16x128xbf16>
    %3 = vector.shape_cast %2 : vector<1x16x128xbf16> to vector<16x128xbf16>
    %cst = arith.constant dense<0.000000e+00> : vector<8x128xf32>
    %4 = tpu.matmul %1, %3, %cst {dimension_numbers = #tpu.dot_dimension_numbers<[1], [0], [0], [1], [0, 0, 1, 1], [], []>} : vector<8x16xbf16>, vector<16x128xbf16>, vector<8x128xf32> -> vector<8x128xf32>
    %c0_4 = arith.constant 0 : index
    %c0_5 = arith.constant 0 : index
    %c0_6 = arith.constant 0 : index
    %5 = vector.load %arg3[%c0_4, %c0_5, %c0_6] : memref<3x1x128xf32, #tpu.memory_space<vmem>>, vector<1x1x128xf32>
    %6 = vector.shape_cast %5 : vector<1x1x128xf32> to vector<1x128xf32>
    %7 = vector.broadcast %6 : vector<1x128xf32> to vector<8x128xf32>
    %8 = arith.addf %4, %7 : vector<8x128xf32>
    %cst_7 = arith.constant 0.000000e+00 : f32
    %9 = vector.broadcast %cst_7 : f32 to vector<8x128xf32>
    %10 = arith.maximumf %8, %9 : vector<8x128xf32>
    %11 = arith.truncf %10 : vector<8x128xf32> to vector<8x128xbf16>
    %c1 = arith.constant 1 : index
    %c0_8 = arith.constant 0 : index
    %c0_9 = arith.constant 0 : index
    %12 = vector.load %arg2[%c1, %c0_8, %c0_9] : memref<3x128x128xbf16, #tpu.memory_space<vmem>>, vector<1x128x128xbf16>
    %13 = vector.shape_cast %12 : vector<1x128x128xbf16> to vector<128x128xbf16>
    %cst_10 = arith.constant dense<0.000000e+00> : vector<8x128xf32>
    %14 = tpu.matmul %11, %13, %cst_10 {dimension_numbers = #tpu.dot_dimension_numbers<[1], [0], [0], [1], [0, 0, 1, 1], [], []>} : vector<8x128xbf16>, vector<128x128xbf16>, vector<8x128xf32> -> vector<8x128xf32>
    %c1_11 = arith.constant 1 : index
    %c0_12 = arith.constant 0 : index
    %c0_13 = arith.constant 0 : index
    %15 = vector.load %arg3[%c1_11, %c0_12, %c0_13] : memref<3x1x128xf32, #tpu.memory_space<vmem>>, vector<1x1x128xf32>
    %16 = vector.shape_cast %15 : vector<1x1x128xf32> to vector<1x128xf32>
    %17 = vector.broadcast %16 : vector<1x128xf32> to vector<8x128xf32>
    %18 = arith.addf %14, %17 : vector<8x128xf32>
    %cst_14 = arith.constant 0.000000e+00 : f32
    %19 = vector.broadcast %cst_14 : f32 to vector<8x128xf32>
    %20 = arith.maximumf %18, %19 : vector<8x128xf32>
    %21 = arith.truncf %20 : vector<8x128xf32> to vector<8x128xbf16>
    %c2 = arith.constant 2 : index
    %c0_15 = arith.constant 0 : index
    %c0_16 = arith.constant 0 : index
    %22 = vector.load %arg2[%c2, %c0_15, %c0_16] : memref<3x128x128xbf16, #tpu.memory_space<vmem>>, vector<1x128x128xbf16>
    %23 = vector.shape_cast %22 : vector<1x128x128xbf16> to vector<128x128xbf16>
    %cst_17 = arith.constant dense<0.000000e+00> : vector<8x128xf32>
    %24 = tpu.matmul %21, %23, %cst_17 {dimension_numbers = #tpu.dot_dimension_numbers<[1], [0], [0], [1], [0, 0, 1, 1], [], []>} : vector<8x128xbf16>, vector<128x128xbf16>, vector<8x128xf32> -> vector<8x128xf32>
    %c2_18 = arith.constant 2 : index
    %c0_19 = arith.constant 0 : index
    %c0_20 = arith.constant 0 : index
    %25 = vector.load %arg3[%c2_18, %c0_19, %c0_20] : memref<3x1x128xf32, #tpu.memory_space<vmem>>, vector<1x1x128xf32>
    %26 = vector.shape_cast %25 : vector<1x1x128xf32> to vector<1x128xf32>
    %27 = vector.broadcast %26 : vector<1x128xf32> to vector<8x128xf32>
    %28 = arith.addf %24, %27 : vector<8x128xf32>
    %29 = vector.extract_strided_slice %28 {offsets = [0, 0], sizes = [8, 4], strides = [1, 1]} : vector<8x128xf32> to vector<8x4xf32>
    %c0_21 = arith.constant 0 : index
    %c0_22 = arith.constant 0 : index
    %30 = vector.load %arg4[%c0_21, %c0_22] : memref<8x4xf32, #tpu.memory_space<vmem>>, vector<8x4xf32>
    tpu.vector_store %arg4[%c0_21, %c0_22], %29 {strides = array<i32>} : memref<8x4xf32, #tpu.memory_space<vmem>>, vector<8x4xf32>,
    return
  }
  func.func @transform_0(%arg0: i32) -> (i32, i32) {
    %c0_i32 = arith.constant 0 : i32
    %c0_i32_0 = arith.constant 0 : i32
    return %arg0, %c0_i32 : i32, i32
  }
  func.func @transform_1(%arg0: i32) -> (i32, i32, i32) {
    %c0_i32 = arith.constant 0 : i32
    %c0_i32_0 = arith.constant 0 : i32
    %c0_i32_1 = arith.constant 0 : i32
    %c0_i32_2 = arith.constant 0 : i32
    return %c0_i32, %c0_i32_0, %c0_i32_1 : i32, i32, i32
  }
  func.func @transform_2(%arg0: i32) -> (i32, i32, i32) {
    %c0_i32 = arith.constant 0 : i32
    %c0_i32_0 = arith.constant 0 : i32
    %c0_i32_1 = arith.constant 0 : i32
    %c0_i32_2 = arith.constant 0 : i32
    return %c0_i32, %c0_i32_0, %c0_i32_1 : i32, i32, i32
  }
  func.func @transform_3(%arg0: i32) -> (i32, i32) {
    %c0_i32 = arith.constant 0 : i32
    %c0_i32_0 = arith.constant 0 : i32
    return %arg0, %c0_i32 : i32, i32
  }
}

</mosaic_0001>

<bundles_post_ra>
// kernel: _forward.1
= control target key start
LH: loop header
LB: loop body
LE: loop exit
PB: predicated region body
PF: predicated region fallthrough
CT: control target
= control target key end

     0   :  { %8 = vsyncpa [#allocation3], 0  ;;  %s589_s0 = inlined_call_operand.hbm [shape: f32[8,16], index: 0, kind: input, shape index: {}]   ;;  %s590_s1 = inlined_call_operand.hbm [shape: bf16[3,128,128], index: 1, kind: input, shape index: {}]   ;;  %s591_s2 = inlined_call_operand.vmem [shape: f32[3,1,128], index: 2, kind: input, shape index: {}]   ;;  %s592_s3 = inlined_call_operand.vmem [shape: f32[8,4], index: 3, kind: output, shape index: {}]  }
   0x1   :  { %9 = vsyncpa [#allocation5], 0  ;;  %s500_s12 = smov [#allocation2]   ;;  %s501_s14 = smov [#allocation4]  }
   0x2   :  { %s16_s13 = sshll.u32 %s500_s12, 4  ;;  %s25_s15 = sshll.u32 %s501_s14, 4  ;;  %s17_s13 = int_to_ptr.vmem [resolvable:$true] %s16_s13  ;;  %s526_s15 = int_to_ptr.vmem [resolvable:$true] %s25_s15 }
   0x3   :  { %s452_s18 = scalar_lea.hbm %s589_s0, 128 }
   0x4   :  { %p453_p0 = scmp.ne.s32.totalorder %s589_s0, %s452_s18  ;;  %p456_p1 = scmp.lt.u32.totalorder %s452_s18, %s589_s0 }
   0x6   :  { %p458_p2 = pnand %p456_p1, %p453_p0 }
   0x8   :  { %461 = shalt.err (!%p458_p2)
}
   0x9   :  { %s462_s23 = scalar_lea.vmem %s17_s13, 128  ;;  %p467_p4 = scmp.lt.s32.totalorder %s17_s13, %s17_s13 }
   0xa   :  { %p463_p3 = scmp.ne.s32.totalorder %s17_s13, %s462_s23  ;;  %p468_p5 = scmp.lt.s32.totalorder %s462_s23, %s462_s23 }
   0xc   :  { %p469_p6 = por %p468_p5, %p467_p4 }
   0xe   :  { %p470_p7 = pnand %p469_p6, %p463_p3 }
  0x10   :  { %473 = shalt.err (!%p470_p7)
}
  0x11   :  { %19 = dma.hbm_to_vmem [thread:$0]  %s589_s0, 128, %s17_s13, [#allocation3]  }
  0x12   :  { %s474_s28 = scalar_lea.hbm %s590_s1, 3072 }
  0x13   :  { %p475_p8 = scmp.ne.s32.totalorder %s590_s1, %s474_s28  ;;  %p478_p9 = scmp.lt.u32.totalorder %s474_s28, %s590_s1 }
  0x15   :  { %p480_p10 = pnand %p478_p9, %p475_p8 }
  0x17   :  { %483 = shalt.err (!%p480_p10)
}
  0x18   :  { %s484_s6 = scalar_lea.vmem %s526_s15, 3072  ;;  %p489_p12 = scmp.lt.s32.totalorder %s526_s15, %s526_s15 }
  0x19   :  { %p485_p11 = scmp.ne.s32.totalorder %s526_s15, %s484_s6  ;;  %p490_p13 = scmp.lt.s32.totalorder %s484_s6, %s484_s6 }
  0x1b   :  { %p491_p0 = por %p490_p13, %p489_p12 }
  0x1d   :  { %p492_p1 = pnand %p491_p0, %p485_p11 }
  0x1f   :  { %495 = shalt.err (!%p492_p1)
}
  0x20   :  { %s502_s0 = smov 64   ;;  %s503_s7 = smov 4  }
  0x21   :  { %31 = dma.hbm_to_vmem [thread:$0]  %s590_s1, 3072, %s526_s15, [#allocation5], %s502_s0, %s502_s0, %s503_s7  }
  0x22   :  { %496 = dma.done.wait [#allocation3], 128  }
  0x23   :  { %497 = vsyncadd [#allocation3], 4294967168 }
  0x24   :  { %498 = dma.done.wait [#allocation5], 3072  }
  0x25   :  { %499 = vsyncadd [#allocation5], 4294964224  ;;  %v504_v0 = vmov 0.0   ;;  %vm505_vm0 = vmmov 0   ;;  %v435_v1 = vld [vmem:[#allocation4] sm:$0xff]   ;;  %v41_v2 = vld [vmem:[#allocation2] sm:$0xff] }
  0x26   :  { %383 = vmatprep.subr.bf16.mxu0 %v504_v0  ;;  %385 = vmatprep.mubr.msk.bf16.mxu0 %vm505_vm0, %v504_v0  ;;  %v42_v3 = vpack.c.bf16 %v41_v2, %v41_v2  ;;  %vm58_vm1 = vcmask 130048   ;;  %v436_v4 = vld [vmem:[#allocation4 + $0x40] sm:$0xff]   ;;  %v437_v5 = vld [vmem:[#allocation4 + $0x48] sm:$0xff]   ;;  %v438_v6 = vld [vmem:[#allocation4 + $0x50] sm:$0xff]   ;;  %vm332_vm2 = vcmask 31744  }
  0x27   :  { %389 = vmatprep.subr.bf16.mxu1 %v504_v0  ;;  %405 = vmatprep.mubr.msk.bf16.mxu1 %vm505_vm0, %v504_v0  ;;  %v439_v7 = vld [vmem:[#allocation4 + $0x58] sm:$0xff]   ;;  %v440_v8 = vld [vmem:[#allocation4 + $0x60] sm:$0xff]   ;;  %v441_v9 = vld [vmem:[#allocation4 + $0x68] sm:$0xff]  }
  0x28   :  { %384 = vmatpush3.bf16.msra.mxu0 %v435_v1  ;;  %390 = vmatpush3.bf16.msra.mxu1 %v436_v4  ;;  %v442_v10 = vld [vmem:[#allocation4 + $0x70] sm:$0xff]   ;;  %v443_v11 = vld [vmem:[#allocation4 + $0x78] sm:$0xff]   ;;  %v444_v12 = vld [vmem:[#allocation4 + $0x80] sm:$0xff]  }
  0x29   :  { %409 = vmatprep.subr.bf16.mxu0 %v504_v0  ;;  %391 = vmatprep.subr.bf16.mxu1 %v504_v0  ;;  %v445_v13 = vld [vmem:[#allocation4 + $0x88] sm:$0xff]   ;;  %v446_v14 = vld [vmem:[#allocation4 + $0x90] sm:$0xff]   ;;  %v447_v15 = vld [vmem:[#allocation4 + $0x98] sm:$0xff]  }
  0x2a   :  { %v448_v16 = vld [vmem:[#allocation4 + $0xa0] sm:$0xff]   ;;  %v449_v17 = vld [vmem:[#allocation4 + $0xa8] sm:$0xff]   ;;  %v340_v18 = vld [vmem:[%s591_s2] ss:$0 sm:$0xff] }
  0x2b   :  { %386 = vmatmul.mubr.msk.bf16.vlgmr.msra.gmra.mrb[0].mxu0 %vm58_vm1, %v42_v3  ;;  %v450_v26 = vld [vmem:[#allocation4 + $0xb0] sm:$0xff]   ;;  %v451_v27 = vld [vmem:[#allocation4 + $0xb8] sm:$0xff]  }
  0x2c   :  { %425 = vmatprep.mubr.msk.bf16.mxu0 %vm505_vm0, %v504_v0  ;;  %392 = vmatpush3.bf16.msra.mxu1 %v437_v5  ;;  %v344_v28 = vld [vmem:[%s591_s2 + $0x1] ss:$0 sm:$0xff]  ;;  %v354_v36 = vld [vmem:[%s591_s2 + $0x2] ss:$0 sm:$0xff] }
  0x2d   :  { %393 = vmatprep.subr.bf16.mxu1 %v504_v0  ;;  %410 = vmatpush3.bf16.msra.mxu0 %v444_v12 }
  0x2e   :  { %411 = vmatprep.subr.bf16.mxu0 %v504_v0 }
  0x30   :  { %394 = vmatpush3.bf16.msra.mxu1 %v438_v6 }
  0x31   :  { %395 = vmatprep.subr.bf16.mxu1 %v504_v0  ;;  %412 = vmatpush3.bf16.msra.mxu0 %v445_v13 }
  0x32   :  { %413 = vmatprep.subr.bf16.mxu0 %v504_v0 }
  0x34   :  { %396 = vmatpush3.bf16.msra.mxu1 %v439_v7 }
  0x35   :  { %397 = vmatprep.subr.bf16.mxu1 %v504_v0  ;;  %414 = vmatpush3.bf16.msra.mxu0 %v446_v14 }
  0x36   :  { %415 = vmatprep.subr.bf16.mxu0 %v504_v0 }
  0x38   :  { %398 = vmatpush3.bf16.msra.mxu1 %v440_v8 }
  0x39   :  { %399 = vmatprep.subr.bf16.mxu1 %v504_v0  ;;  %416 = vmatpush3.bf16.msra.mxu0 %v447_v15 }
  0x3a   :  { %417 = vmatprep.subr.bf16.mxu0 %v504_v0 }
  0x3c   :  { %400 = vmatpush3.bf16.msra.mxu1 %v441_v9 }
  0x3d   :  { %401 = vmatprep.subr.bf16.mxu1 %v504_v0  ;;  %418 = vmatpush3.bf16.msra.mxu0 %v448_v16 }
  0x3e   :  { %419 = vmatprep.subr.bf16.mxu0 %v504_v0 }
  0x40   :  { %402 = vmatpush3.bf16.msra.mxu1 %v442_v10 }
  0x41   :  { %403 = vmatprep.subr.bf16.mxu1 %v504_v0  ;;  %420 = vmatpush3.bf16.msra.mxu0 %v449_v17 }
  0x42   :  { %421 = vmatprep.subr.bf16.mxu0 %v504_v0 }
  0x44   :  { %404 = vmatpush3.bf16.msra.mxu1 %v443_v11 }
  0x45   :  { %422 = vmatpush3.bf16.msra.mxu0 %v450_v26 }
  0x46   :  { %423 = vmatprep.subr.bf16.mxu0 %v504_v0 }
  0x49   :  { %424 = vmatpush3.bf16.msra.mxu0 %v451_v27 }
  0xfe   :  { %v96_v19 = vpop.f32.mrb[0].mxu0 }
  0xff   :  { %v97_v20 = vadd.f32 %v340_v18, %v96_v19  ;;  %v387_v21 = vpop.f32.mrb[1].mxu0 }
 0x100   :  { %v99_v22 = vpop.f32.mrb[2].mxu0 }
 0x101   :  { %v102_v23 = vmax.f32 %v97_v20, 0.0  ;;  %v388_v24 = vpop.f32.mrb[3].mxu0 }
 0x103   :  { %v103_v25 = vpack.c.bf16 %v102_v23, %v102_v23 }
 0x105   :  { %406 = vmatmul.mubr.bf16.vlgmr.msra.gmra.mrb[0].mxu1 %v103_v25 }
 0x1d8   :  { %v211_v29 = vpop.f32.mrb[0].mxu1 }
 0x1d9   :  { %v212_v30 = vadd.f32 %v344_v28, %v211_v29  ;;  %v407_v31 = vpop.f32.mrb[1].mxu1 }
 0x1da   :  { %v214_v32 = vpop.f32.mrb[2].mxu1 }
 0x1db   :  { %v217_v33 = vmax.f32 %v212_v30, 0.0  ;;  %v408_v34 = vpop.f32.mrb[3].mxu1 }
 0x1dd   :  { %v218_v35 = vpack.c.bf16 %v217_v33, %v217_v33 }
 0x1df   :  { %426 = vmatmul.mubr.bf16.vlgmr.msra.gmra.mrb[4].mxu0 %v218_v35 }
 0x2b2   :  { %v326_v37 = vpop.f32.mrb[4].mxu0 }
 0x2b3   :  { %v327_v38 = vadd.f32 %v354_v36, %v326_v37  ;;  %v427_v39 = vpop.f32.mrb[5].mxu0 }
 0x2b4   :  { %v329_v40 = vpop.f32.mrb[6].mxu0 }
 0x2b5   :  { %333 = vst.msk [vmem:[%s592_s3] sm:$0xff] %vm332_vm2, %v327_v38  ;;  %v428_v41 = vpop.f32.mrb[7].mxu0 }
 0x2b6   :  { %338 = vsyncpa [#allocation3], 1 }
 0x2b7   :  { %339 = vsyncpa [#allocation5], 1 }

</bundles_post_ra>
